<compile_context>
chip_gen: v6e
topology: v6e:2x2x1
jax: 0.10.0
libtpu: 0.0.40
codegen_flags: <defaults>
</compile_context>

<pallas_src>
import functools

import jax
import jax.numpy as jnp
from jax.experimental import pallas as pl
from jax.experimental.pallas import tpu as pltpu


def _policy_head_kernel_2d(x_ref, w_ref, b_ref, o_ref):
    # x_ref: (C, THW) one (squeezed) image tile, H*W on lanes
    # w_ref: (A, C)   full weight (PyTorch nn.Linear layout: (out, in))
    # b_ref: (A, 1)   f32 bias, broadcast along the lane axis
    # o_ref: (A, THW) logits tile (lane-dense last dim)
    acc = jnp.dot(w_ref[...], x_ref[...], preferred_element_type=jnp.float32)
    o_ref[...] = (acc + b_ref[...]).astype(o_ref.dtype)


def _policy_head_kernel_batched(x_ref, w_ref, b_ref, o_ref):
    # x_ref: (BT, C, THW), o_ref: (BT, A, THW); BT is a small static constant,
    # so a static unroll of independent MXU dots is the simplest correct form.
    w = w_ref[...]
    b = b_ref[...]
    for i in range(x_ref.shape[0]):
        acc = jnp.dot(w, x_ref[i], preferred_element_type=jnp.float32)
        o_ref[i] = (acc + b).astype(o_ref.dtype)


def _choose_tiles(bsz, c, hw, a, x_item, o_item,
                  vmem_budget=12 << 20, target_step_bytes=2 << 20):
    """Pick (batch_tile, hw_tile).

    Goals: multi-MiB per-step slabs (amortize fixed per-step cost on the
    serial grid of single-TC v5e/v6e) while double-buffered blocks stay well
    inside v7x's smaller VMEM, and >=2 grid points whenever possible so the
    two v7x TensorCores both have work.
    """
    def step_bytes(bt, thw):
        return bt * thw * (c * x_item + a * o_item)

    # HW tile: prefer the full extent; otherwise the largest 128-multiple
    # divisor whose double-buffered block fits the budget.
    if hw % 128 == 0:
        hw_cands = [t for t in range(128, hw + 1, 128) if hw % t == 0]
    else:
        hw_cands = [hw]                       # full-extent block (no 128 rule)
    tile_hw = hw_cands[0]
    for t in reversed(hw_cands):
        if 2 * step_bytes(1, t) <= vmem_budget:
            tile_hw = t
            break
    n_hw = hw // tile_hw

    # Batch tile: grow until the step slab reaches a few MiB, but never
    # collapse the grid to a single point if >=2 points are achievable.
    bt = 1
    for cand in range(2, bsz + 1):
        if bsz % cand:
            continue
        if 2 * step_bytes(cand, tile_hw) > vmem_budget:
            break
        if (bsz // cand) * n_hw < 2 <= bsz * n_hw:
            break
        bt = cand
        if step_bytes(bt, tile_hw) >= target_step_bytes:
            break
    return bt, tile_hw


def policy_head_pallas(x_bcs, w, bias, *, out_dtype=jnp.float32,
                       batch_tile=None, hw_tile=None):
    """x_bcs: (B, C, H*W), w: (A, C) f32, bias: (A,) f32 -> (B, A, H*W)."""
    bsz, c, hw = x_bcs.shape
    a = w.shape[0]
    # Tiny (A, C) weight: cast to the activation stream's dtype (f32 or bf16).
    w_cast = w.astype(x_bcs.dtype)
    bias2 = bias.reshape(a, 1).astype(jnp.float32)

    x_item = jnp.dtype(x_bcs.dtype).itemsize
    o_item = jnp.dtype(out_dtype).itemsize
    bt_auto, thw_auto = _choose_tiles(bsz, c, hw, a, x_item, o_item)
    bt = batch_tile if batch_tile is not None else bt_auto
    thw = hw_tile if hw_tile is not None else thw_auto
    assert bsz % bt == 0 and hw % thw == 0

    grid = (bsz // bt, hw // thw)

    if bt == 1:
        kernel = _policy_head_kernel_2d
        x_spec = pl.BlockSpec((pl.Squeezed(), c, thw), lambda b, s: (b, 0, s))
        o_spec = pl.BlockSpec((pl.Squeezed(), a, thw), lambda b, s: (b, 0, s))
    else:
        kernel = _policy_head_kernel_batched
        x_spec = pl.BlockSpec((bt, c, thw), lambda b, s: (b, 0, s))
        o_spec = pl.BlockSpec((bt, a, thw), lambda b, s: (b, 0, s))

    cost = pl.CostEstimate(
        flops=2 * bsz * hw * c * a,
        transcendentals=0,
        bytes_accessed=(bsz * c * hw * x_item      # X (dominant stream)
                        + a * c * x_item           # W
                        + a * 4                    # bias
                        + bsz * a * hw * o_item),  # logits out
    )

    # NOTE: if the grid ever becomes long with small blocks, raising the X
    # spec's pipelining depth (pipeline_mode=pl.Buffered(3)) is cheap
    # insurance; irrelevant at these grid sizes.
    return pl.pallas_call(
        kernel,
        out_shape=jax.ShapeDtypeStruct((bsz, a, hw), out_dtype),
        grid_spec=pltpu.PrefetchScalarGridSpec(
            num_scalar_prefetch=0,
            grid=grid,
            in_specs=[
                x_spec,
                pl.BlockSpec((a, c), lambda b, s: (0, 0)),
                pl.BlockSpec((a, 1), lambda b, s: (0, 0)),
            ],
            out_specs=o_spec,
        ),
        compiler_params=pltpu.CompilerParams(
            # Both axes produce disjoint output tiles -> fully parallel
            # (megacore sharding on v7x; harmless on single-TC v5e/v6e).
            dimension_semantics=("parallel", "parallel"),
            # Explicit scoped-VMEM limit: plenty for the <=12 MiB of
            # double-buffered blocks, with headroom under v7x's 64 MiB.
            vmem_limit_bytes=32 * 1024 * 1024,
        ),
        cost_estimate=cost,
    )(x_bcs, w_cast, bias2)


class PolicyNetworkPallas:
    """JAX/Pallas equivalent of the PyTorch PolicyNetwork forward pass."""

    # TODO(synk): act()/get_log_prob() (softmax/argmax/gather/prod epilogue)
    # are not ported; only forward() is implemented here.

    def __init__(self, feature_size, num_unit_actions, num_citytile_actions,
                 key, logits_dtype=jnp.float32):
        self.feature_size = feature_size
        self.num_unit_actions = num_unit_actions
        self.num_citytile_actions = num_citytile_actions
        self.num_actions = num_unit_actions + num_citytile_actions
        # bf16 logits halve the writeback/transpose traffic if the downstream
        # softmax/argmax tolerates it; f32 is the safe default.
        self.logits_dtype = logits_dtype

        k_w, k_b = jax.random.split(key)
        bound = 1.0 / (feature_size ** 0.5)
        # PyTorch nn.Linear layout: weight is (out_features, in_features)=(A,C)
        # so the kernel computes W @ X directly (same math as x @ W.T).
        self.w = jax.random.uniform(
            k_w, (self.num_actions, feature_size), jnp.float32, -bound, bound)
        self.bias = jax.random.uniform(
            k_b, (self.num_actions,), jnp.float32, -bound, bound)

    @functools.partial(jax.jit, static_argnums=0)
    def forward(self, feature):
        # feature: (B, C, H, W) NCHW, f32 or bf16 -- consumed as-is (no extra
        # wrapper-side cast pass over the dominant X stream).
        b, c, h, w = feature.shape
        x = feature.reshape(b, c, h * w)                    # free reshape
        logits = policy_head_pallas(x, self.w, self.bias,
                                    out_dtype=self.logits_dtype)  # (B,A,HW)
        # Permute/split only the tiny logits tensor (spec requires NHWC).
        out = logits.reshape(b, self.num_actions, h, w)
        out = jnp.transpose(out, (0, 2, 3, 1))              # (B, H, W, A)
        out1 = out[..., : self.num_unit_actions]
        out2 = out[..., self.num_unit_actions:]
        return out1, out2

    @functools.partial(jax.jit, static_argnums=0)
    def forward_nchw(self, feature):
        # Transpose-free variant for consumers that accept NCHW logits:
        # returns (B, num_unit, H, W), (B, num_citytile, H, W).
        b, c, h, w = feature.shape
        x = feature.reshape(b, c, h * w)
        logits = policy_head_pallas(x, self.w, self.bias,
                                    out_dtype=self.logits_dtype)
        out = logits.reshape(b, self.num_actions, h, w)
        return out[:, : self.num_unit_actions], out[:, self.num_unit_actions:]


if __name__ == "__main__":
    key = jax.random.PRNGKey(0)
    k_param, k_in = jax.random.split(key)

    B, C, H, W = 2, 32, 16, 16          # feature_size = 32
    NUM_UNIT_ACTIONS = 8
    NUM_CITYTILE_ACTIONS = 4

    net = PolicyNetworkPallas(C, NUM_UNIT_ACTIONS, NUM_CITYTILE_ACTIONS, k_param)
    feature = jax.random.normal(k_in, (B, C, H, W), jnp.float32)

    out1, out2 = net.forward(feature)
    jax.block_until_ready((out1, out2))

    # Pure-JAX reference of the same math as the PyTorch module.
    x_ref = jnp.transpose(feature, (0, 2, 3, 1)).reshape(-1, C)
    ref = (x_ref @ net.w.T + net.bias).reshape(B, H, W, -1)
    ref1, ref2 = ref[..., :NUM_UNIT_ACTIONS], ref[..., NUM_UNIT_ACTIONS:]
    assert out1.shape == (B, H, W, NUM_UNIT_ACTIONS)
    assert out2.shape == (B, H, W, NUM_CITYTILE_ACTIONS)
    assert jnp.allclose(out1, ref1, atol=1e-5) and jnp.allclose(out2, ref2, atol=1e-5)

    # bf16 producer path: feed bf16 activations straight to the kernel (no
    # extra HBM cast pass); MXU accumulates in f32, logits stay f32.  This is
    # the recommended mode on v5e/v6e/v7x (halves the dominant X stream).
    o1b, o2b = net.forward(feature.astype(jnp.bfloat16))
    jax.block_until_ready((o1b, o2b))
    assert jnp.allclose(o1b, ref1, atol=5e-2) and jnp.allclose(o2b, ref2, atol=5e-2)

    # Transpose-free NCHW output path.
    n1, n2 = net.forward_nchw(feature)
    jax.block_until_ready((n1, n2))
    assert jnp.allclose(jnp.transpose(n1, (0, 2, 3, 1)), ref1, atol=1e-5)
    assert jnp.allclose(jnp.transpose(n2, (0, 2, 3, 1)), ref2, atol=1e-5)

    # Explicitly exercise the multi-image-per-step kernel path (the one the
    # heuristic picks for large B on single-TC v5e/v6e).
    logits_bt = policy_head_pallas(feature.reshape(B, C, H * W),
                                   net.w, net.bias, batch_tile=B)
    jax.block_until_ready(logits_bt)
    ref_logits = (jnp.einsum('ac,bch->bah', net.w, feature.reshape(B, C, H * W))
                  + net.bias[None, :, None])
    assert jnp.allclose(logits_bt, ref_logits, atol=1e-5)

    print("KERNEL_OK")
</pallas_src>

<mosaic_0001>
module attributes {stable_mosaic.version = 11 : i64} {
  func.func @_policy_head_kernel_2d(%arg0: i32, %arg1: i32, %arg2: memref<1x32x256xf32, #tpu.memory_space<vmem>>, %arg3: memref<12x32xf32, #tpu.memory_space<vmem>>, %arg4: memref<12x1xf32, #tpu.memory_space<vmem>>, %arg5: memref<1x12x256xf32, #tpu.memory_space<vmem>>) attributes {dimension_semantics = [#tpu.dimension_semantics<parallel>, #tpu.dimension_semantics<parallel>], iteration_bounds = array<i64: 2, 1>, scalar_prefetch = 0 : i64, scratch_operands = 0 : i64, tpu.core_type = #tpu.core_type<tc>, window_params = [{transform_indices = @transform_0, window_bounds = array<i64: 1, 32, 256>}, {pipeline_mode = #tpu.pipeline_mode<synchronous>, transform_indices = @transform_1, window_bounds = array<i64: 12, 32>}, {pipeline_mode = #tpu.pipeline_mode<synchronous>, transform_indices = @transform_2, window_bounds = array<i64: 12, 1>}, {transform_indices = @transform_3, window_bounds = array<i64: 1, 12, 256>}]} {
    %c0 = arith.constant 0 : index
    %c0_0 = arith.constant 0 : index
    %0 = vector.load %arg3[%c0, %c0_0] : memref<12x32xf32, #tpu.memory_space<vmem>>, vector<12x32xf32>
    %c0_1 = arith.constant 0 : index
    %c0_2 = arith.constant 0 : index
    %c0_3 = arith.constant 0 : index
    %1 = vector.load %arg2[%c0_1, %c0_2, %c0_3] : memref<1x32x256xf32, #tpu.memory_space<vmem>>, vector<1x32x256xf32>
    %2 = vector.shape_cast %1 : vector<1x32x256xf32> to vector<32x256xf32>
    %cst = arith.constant dense<0.000000e+00> : vector<12x256xf32>
    %3 = tpu.matmul %0, %2, %cst {dimension_numbers = #tpu.dot_dimension_numbers<[1], [0], [0], [1], [0, 0, 1, 1], [], []>} : vector<12x32xf32>, vector<32x256xf32>, vector<12x256xf32> -> vector<12x256xf32>
    %c0_4 = arith.constant 0 : index
    %c0_5 = arith.constant 0 : index
    %4 = vector.load %arg4[%c0_4, %c0_5] : memref<12x1xf32, #tpu.memory_space<vmem>>, vector<12x1xf32>
    %5 = vector.broadcast %4 : vector<12x1xf32> to vector<12x256xf32>
    %6 = arith.addf %3, %5 : vector<12x256xf32>
    %c0_6 = arith.constant 0 : index
    %c0_7 = arith.constant 0 : index
    %c0_8 = arith.constant 0 : index
    %7 = vector.load %arg5[%c0_6, %c0_7, %c0_8] : memref<1x12x256xf32, #tpu.memory_space<vmem>>, vector<1x12x256xf32>
    %8 = vector.shape_cast %7 : vector<1x12x256xf32> to vector<12x256xf32>
    %9 = vector.shape_cast %6 : vector<12x256xf32> to vector<1x12x256xf32>
    tpu.vector_store %arg5[%c0_6, %c0_7, %c0_8], %9 {strides = array<i32>} : memref<1x12x256xf32, #tpu.memory_space<vmem>>, vector<1x12x256xf32>,
    return
  }
  func.func @transform_0(%arg0: i32, %arg1: i32) -> (i32, i32, i32) {
    %c0_i32 = arith.constant 0 : i32
    %c0_i32_0 = arith.constant 0 : i32
    return %arg0, %c0_i32, %arg1 : i32, i32, i32
  }
  func.func @transform_1(%arg0: i32, %arg1: i32) -> (i32, i32) {
    %c0_i32 = arith.constant 0 : i32
    %c0_i32_0 = arith.constant 0 : i32
    %c0_i32_1 = arith.constant 0 : i32
    return %c0_i32, %c0_i32_0 : i32, i32
  }
  func.func @transform_2(%arg0: i32, %arg1: i32) -> (i32, i32) {
    %c0_i32 = arith.constant 0 : i32
    %c0_i32_0 = arith.constant 0 : i32
    %c0_i32_1 = arith.constant 0 : i32
    return %c0_i32, %c0_i32_0 : i32, i32
  }
  func.func @transform_3(%arg0: i32, %arg1: i32) -> (i32, i32, i32) {
    %c0_i32 = arith.constant 0 : i32
    %c0_i32_0 = arith.constant 0 : i32
    return %arg0, %c0_i32, %arg1 : i32, i32, i32
  }
}

</mosaic_0001>

<bundles_post_ra>
// kernel: forward.1
= control target key start
LH: loop header
LB: loop body
LE: loop exit
PB: predicated region body
PF: predicated region fallthrough
CT: control target
= control target key end

     0   :  { %s503_s12 = smov 0   ;;  %s505_s13 = smov 0   ;;  %s552_s0 = inlined_call_operand.vmem [shape: f32[2,32,256], index: 0, kind: input, shape index: {}]   ;;  %s553_s1 = inlined_call_operand.vmem [shape: f32[12,32], index: 1, kind: input, shape index: {}]   ;;  %s554_s2 = inlined_call_operand.vmem [shape: f32[12,1], index: 2, kind: input, shape index: {}]   ;;  %s555_s3 = inlined_call_operand.vmem [shape: f32[2,12,256], index: 3, kind: output, shape index: {}]  }
   0x1   :  { %s507_s14 = smov 0  }
   0x2 LB: > { %s25_s15 = sadd.s32 1, %s475_s13  ;;  %p411_p0 = scmp.ge.s32.totalorder %s479_s14, 1  ;;  %s479_s14 = sphi %s507_s14, %s13_s14   ;;  %s475_s13 = sphi %s505_s13, %s557_s13   ;;  %s471_s12 = sphi %s503_s12, %s556_s12  }
   0x3   : > { %p27_p1 = scmp.ge.s32.totalorder %s25_s15, 2  ;;  %p158_p2 = scmp.lt.s32.totalorder %s479_s14, 3 }
   0x5   : > { %s559_s15 = smov (%p27_p1, %s25_s15), 0  ;;  %p159_p3 = pnand %p411_p0, %p158_p2 }
   0x6   : > { %p191_p4 = scmp.lt.s32.totalorder (!%p159_p3), %s471_s12, 1 }
   0x7   : > { %162 = sbr.rel (%p159_p3) target bundleno = 222 (0xde), region = 32 }
   0xc   : > { %v481_v0 = vmov 0.0   ;;  %v220_v1 = vld [vmem:[%s554_s2] sm:$0xff]  ;;  %s561_s12 = smov (!%p191_p4, %s471_s12), 1  ;;  %v482_v2 = vmov 0   ;;  %vm232_vm0 = vcmask 261120  }
   0xd   : > { %303 = vmatprep.mubr.f32.mxu0 %v481_v0  ;;  %309 = vmatprep.mubr.f32.mxu1 %v481_v0  ;;  %s420_s18 = sshll.u32 %s561_s12, 6  ;;  %v210_v11 = vld [vmem:[%s553_s1] sm:$0xff]  ;;  %v211_v12 = vld [vmem:[%s553_s1 + $0x8] sm:$0xf]  ;;  %s421_s28 = sshll.u32 %s561_s12, 5 }
   0xe   : > { %456 = vset.pattern.permute.xlu0 %v482_v2  ;;  %s198_s21 = scalar_lea.vmem %s552_s0, %s420_s18  ;;  %v221_v13 = vld [vmem:[%s554_s2 + $0x8] sm:$0xf]  ;;  %s208_s4 = scalar_lea.vmem %s555_s3, %s421_s28 }
   0xf   : > { %224 = vperm.xlu0 %456, %v220_v1   ;;  %v219_v3 = vld [vmem:[%s198_s21 + $0x38] sm:$0xff]  ;;  %v218_v4 = vld [vmem:[%s198_s21 + $0x30] sm:$0xff]  ;;  %v217_v5 = vld [vmem:[%s198_s21 + $0x28] sm:$0xff] }
  0x10   : > { %263 = vmatprep.subr.mxu0 %v219_v3  ;;  %422 = vmatprep.subr.mxu1 %v219_v3  ;;  %v216_v6 = vld [vmem:[%s198_s21 + $0x20] sm:$0xff]  ;;  %v215_v7 = vld [vmem:[%s198_s21 + $0x18] sm:$0xff]  ;;  %v214_v8 = vld [vmem:[%s198_s21 + $0x10] sm:$0xff] }
  0x11   : > { %264 = vmatpush1.msra.mxu0 %v218_v4  ;;  %426 = vmatpush1.msra.mxu1 %v218_v4  ;;  %v213_v9 = vld [vmem:[%s198_s21 + $0x8] sm:$0xff]  ;;  %v212_v10 = vld [vmem:[%s198_s21] sm:$0xff] }
  0x12   : > { %265 = vmatprep.subr.mxu0 %v217_v5  ;;  %423 = vmatprep.subr.mxu1 %v217_v5 }
  0x13   : > { %266 = vmatpush1.msra.mxu0 %v216_v6  ;;  %427 = vmatpush1.msra.mxu1 %v216_v6 }
  0x14   : > { %267 = vmatprep.subr.mxu0 %v215_v7  ;;  %424 = vmatprep.subr.mxu1 %v215_v7 }
  0x15   : > { %268 = vmatpush1.msra.mxu0 %v214_v8  ;;  %428 = vmatpush1.msra.mxu1 %v214_v8 }
  0x16   : > { %269 = vmatprep.subr.mxu0 %v213_v9  ;;  %425 = vmatprep.subr.mxu1 %v213_v9 }
  0x17   : > { %270 = vmatpush1.msra.mxu0 %v212_v10  ;;  %429 = vmatpush1.msra.mxu1 %v212_v10 }
  0x18   : > { %416 = vmatmul.mubr.msk.f32.vlgmr.msra.gmra.mxu0 %vm232_vm0, %v210_v11  ;;  %417 = vmatmul.mubr.msk.f32.vlgmr.msra.gmra.mxu1 %vm232_vm0, %v211_v12 }
  0x19   : > { %229 = vperm.xlu0 %456, %v221_v13  }
  0x8a   : > { %v225_v14 = vpop.permute.xlu0 %224 }
  0x94   : > { %v230_v15 = vpop.permute.xlu0 %229 }
  0xd8   : > { %v305_v16 = vpop.f32.mrf.mxu0  ;;  %v311_v17 = vpop.f32.mrf.mxu1 }
  0xd9   : > { %v306_v18 = vadd.f32 %v305_v16, %v225_v14  ;;  %v312_v19 = vadd.f32 %v311_v17, %v230_v15 }
  0xda   : > { %v307_v20 = vpop.f32.mrf.mxu0  ;;  %v313_v21 = vpop.f32.mrf.mxu1 }
  0xdb   : > { %316 = vst [vmem:[%s208_s4] sm:$0xff] %v306_v18  ;;  %318 = vst [vmem:[%s208_s4 + $0x10] sm:$0xf] %v312_v19  ;;  %v308_v22 = vadd.f32 %v307_v20, %v225_v14  ;;  %v314_v23 = vadd.f32 %v313_v21, %v230_v15 }
  0xdd   : > { %317 = vst [vmem:[%s208_s4 + $0x8] sm:$0xff] %v308_v22  ;;  %319 = vst [vmem:[%s208_s4 + $0x18] sm:$0xf] %v314_v23 }
  0xde PF: > { %s13_s14 = sadd.s32 1, %s479_s14   ;;  %s556_s12 = smov %s475_s13 }
  0xdf   : > { %p10_p5 = scmp.ge.s32.totalorder %s13_s14, 4   ;;  %s557_s13 = smov %s559_s15 }
  0xe1   :  { %12 = sbr.rel (!%p10_p5) target bundleno = 2 (0x2), region = 62 }

</bundles_post_ra>
